<compile_context>
chip_gen: v7x
topology: tpu7x:2x2x1
jax: 0.10.0
libtpu: 0.0.40
codegen_flags: <defaults>
</compile_context>

<pallas_src>
import functools

import jax
import jax.numpy as jnp
from jax.experimental import pallas as pl
from jax.experimental.pallas import tpu as pltpu


# --------------------------------------------------------------------------
# label-smoothed cross entropy: per-example loss for one (TILE_N, C) block
# --------------------------------------------------------------------------
def _ce_kernel(x_ref, tgt_ref, loss_ref, *, smoothing: float):
    confidence = 1.0 - smoothing

    x = x_ref[...].astype(jnp.float32)          # (TILE_N, C)
    tgt = tgt_ref[...]                          # (TILE_N, 1) int32
    tile_n, num_classes = x.shape

    # numerically stable log-sum-exp along the lane (class) axis
    m = jnp.max(x, axis=-1, keepdims=True)                                  # (TILE_N, 1)
    lse = m + jnp.log(jnp.sum(jnp.exp(x - m), axis=-1, keepdims=True))      # (TILE_N, 1)

    # fused nll + smoothing reduction:
    #   confidence*nll + smoothing*smooth == lse - sum(x * w)
    #   w_j = smoothing/C + confidence * [j == target]   (sum_j w_j == 1)
    col = jax.lax.broadcasted_iota(jnp.int32, (tile_n, num_classes), 1)
    w = jnp.where(col == tgt,
                  jnp.float32(confidence + smoothing / num_classes),
                  jnp.float32(smoothing / num_classes))                     # (TILE_N, C)
    per_example = lse - jnp.sum(x * w, axis=-1, keepdims=True)              # (TILE_N, 1)

    loss_ref[...] = per_example


# --------------------------------------------------------------------------
# weight_loss over a lane-dense (A, B*Bc) slab (diag of last two dims negated)
# --------------------------------------------------------------------------
def _weight_loss_kernel(w_ref, out_ref, *, diag_stride: int):
    w = w_ref[...].astype(jnp.float32)          # (A, B*Bc)
    a_dim, flat = w.shape

    col = jax.lax.broadcasted_iota(jnp.int32, (a_dim, flat), 1)
    nw = jnp.where(col % diag_stride == 0, -w, w)          # negate diagonal entries
    row_max = jnp.max(nw, axis=-1, keepdims=True)           # (A, 1) == max over dims (1,2)
    out_ref[0, 0] = jnp.sum(row_max) / jnp.float32(a_dim)   # mean over dim 0


# --------------------------------------------------------------------------
# wrapper
# --------------------------------------------------------------------------
def label_smoothing_ce_weight1(x, target, xt, smoothing: float = 0.1):
    """x: (N, C) logits, target: (N,) int, xt: (A, B, Bc) weight tensor."""
    N, C = x.shape
    A, B, Bc = xt.shape
    itemsize = jnp.dtype(x.dtype).itemsize

    # Tile the batch dim: ~4 MiB per logits block (double-buffered -> ~8 MiB),
    # conservative for v7x's 64 MiB physical / 32 MiB scoped VMEM.
    rows_budget = max(8, (4 * 1024 * 1024) // max(1, C * itemsize))
    tile_n = min(512, rows_budget)
    tile_n = max(8, tile_n - tile_n % 8)
    if N <= tile_n:
        tile_n = N                       # single block == full dim (any N allowed)
    grid = (pl.cdiv(N, tile_n),)

    target2d = target.reshape(N, 1).astype(jnp.int32)

    per_example = pl.pallas_call(
        functools.partial(_ce_kernel, smoothing=smoothing),
        out_shape=jax.ShapeDtypeStruct((N, 1), jnp.float32),
        grid_spec=pltpu.PrefetchScalarGridSpec(
            num_scalar_prefetch=0,
            grid=grid,
            in_specs=[
                pl.BlockSpec((tile_n, C), lambda i: (i, 0)),   # logits (native dtype)
                pl.BlockSpec((tile_n, 1), lambda i: (i, 0)),   # targets
            ],
            out_specs=pl.BlockSpec((tile_n, 1), lambda i: (i, 0)),
        ),
        compiler_params=pltpu.CompilerParams(
            dimension_semantics=("parallel",)),
        cost_estimate=pl.CostEstimate(
            flops=5 * N * C,
            transcendentals=N * C,
            bytes_accessed=N * C * itemsize + 2 * N * 4 + N * 4),
    )(x, target2d)

    # Tiny kernel for weight_loss on the lane-dense (A, B*Bc) slab.
    wl = pl.pallas_call(
        functools.partial(_weight_loss_kernel, diag_stride=Bc + 1),
        out_shape=jax.ShapeDtypeStruct((1, 1), jnp.float32),
        in_specs=[pl.BlockSpec(memory_space=pltpu.MemorySpace.VMEM)],
        out_specs=pl.BlockSpec(memory_space=pltpu.MemorySpace.SMEM),
    )(xt.reshape(A, B * Bc))

    # Scalar epilogue (true-N mean + weighted combine) in plain JAX.
    return jnp.sum(per_example) / jnp.float32(N) + wl[0, 0] * jnp.float32(0.1)


# --------------------------------------------------------------------------
# pure-JAX reference mirroring the PyTorch forward
# --------------------------------------------------------------------------
def _reference(x, target, xt, smoothing=0.1):
    confidence = 1.0 - smoothing
    logprobs = jax.nn.log_softmax(x, axis=-1)
    nll = -jnp.take_along_axis(logprobs, target[:, None], axis=-1)[:, 0]
    smooth = -jnp.mean(logprobs, axis=-1)
    loss = jnp.mean(confidence * nll + smoothing * smooth)

    A, B, Bc = xt.shape
    r = jnp.arange(B)[:, None]
    c = jnp.arange(Bc)[None, :]
    mask = jnp.where(r == c, -1.0, 1.0)[None, :, :]
    nw = mask * xt
    wl = jnp.mean(jnp.max(jnp.max(nw, axis=1), axis=1))
    return loss + wl * 0.1


if __name__ == "__main__":
    key = jax.random.PRNGKey(0)
    k1, k2, k3 = jax.random.split(key, 3)

    N, C = 8, 32          # batch, num classes
    A, B = 4, 8           # weight tensor (A, B, B)

    x = jax.random.normal(k1, (N, C), dtype=jnp.float32)
    target = jax.random.randint(k2, (N,), 0, C, dtype=jnp.int32)
    xt = jax.random.normal(k3, (A, B, B), dtype=jnp.float32)

    out = label_smoothing_ce_weight1(x, target, xt, smoothing=0.1)
    out = jax.block_until_ready(out)

    ref = _reference(x, target, xt, smoothing=0.1)
    assert jnp.allclose(out, ref, atol=1e-5, rtol=1e-5), (out, ref)

    print("KERNEL_OK")
</pallas_src>

<mosaic_0001>
module attributes {stable_mosaic.version = 11 : i64} {
  func.func @_ce_kernel(%arg0: i32, %arg1: memref<8x32xf32, #tpu.memory_space<vmem>>, %arg2: memref<8x1xi32, #tpu.memory_space<vmem>>, %arg3: memref<8x1xf32, #tpu.memory_space<vmem>>) attributes {dimension_semantics = [#tpu.dimension_semantics<parallel>], iteration_bounds = array<i64: 1>, scalar_prefetch = 0 : i64, scratch_operands = 0 : i64, tpu.core_type = #tpu.core_type<tc>, window_params = [{transform_indices = @transform_0, window_bounds = array<i64: 8, 32>}, {transform_indices = @transform_1, window_bounds = array<i64: 8, 1>}, {transform_indices = @transform_2, window_bounds = array<i64: 8, 1>}]} {
    %c0 = arith.constant 0 : index
    %c0_0 = arith.constant 0 : index
    %0 = vector.load %arg1[%c0, %c0_0] : memref<8x32xf32, #tpu.memory_space<vmem>>, vector<8x32xf32>
    %c0_1 = arith.constant 0 : index
    %c0_2 = arith.constant 0 : index
    %1 = vector.load %arg2[%c0_1, %c0_2] : memref<8x1xi32, #tpu.memory_space<vmem>>, vector<8x1xi32>
    %cst = arith.constant dense<0xFF800000> : vector<8xf32>
    %2 = vector.multi_reduction <maximumf>, %0, %cst [1] : vector<8x32xf32> to vector<8xf32>
    %3 = vector.shape_cast %2 : vector<8xf32> to vector<8x1xf32>
    %4 = vector.broadcast %3 : vector<8x1xf32> to vector<8x32xf32>
    %5 = arith.subf %0, %4 : vector<8x32xf32>
    %6 = math.exp %5 : vector<8x32xf32>
    %cst_3 = arith.constant dense<0.000000e+00> : vector<8xf32>
    %7 = vector.multi_reduction <add>, %6, %cst_3 [1] : vector<8x32xf32> to vector<8xf32>
    %8 = vector.shape_cast %7 : vector<8xf32> to vector<8x1xf32>
    %9 = math.log %8 : vector<8x1xf32>
    %10 = arith.addf %3, %9 : vector<8x1xf32>
    %11 = tpu.iota {dimensions = array<i32: 1>} : vector<8x32xi32>
    %12 = vector.broadcast %1 : vector<8x1xi32> to vector<8x32xi32>
    %13 = arith.cmpi eq, %11, %12 : vector<8x32xi32>
    %cst_4 = arith.constant 0.903124988 : f32
    %cst_5 = arith.constant 3.125000e-03 : f32
    %14 = vector.broadcast %cst_4 : f32 to vector<8x32xf32>
    %15 = vector.broadcast %cst_5 : f32 to vector<8x32xf32>
    %16 = arith.select %13, %14, %15 : vector<8x32xi1>, vector<8x32xf32>
    %17 = arith.mulf %0, %16 : vector<8x32xf32>
    %cst_6 = arith.constant dense<0.000000e+00> : vector<8xf32>
    %18 = vector.multi_reduction <add>, %17, %cst_6 [1] : vector<8x32xf32> to vector<8xf32>
    %19 = vector.shape_cast %18 : vector<8xf32> to vector<8x1xf32>
    %20 = arith.subf %10, %19 : vector<8x1xf32>
    %c0_7 = arith.constant 0 : index
    %c0_8 = arith.constant 0 : index
    %21 = vector.load %arg3[%c0_7, %c0_8] : memref<8x1xf32, #tpu.memory_space<vmem>>, vector<8x1xf32>
    tpu.vector_store %arg3[%c0_7, %c0_8], %20 {strides = array<i32>} : memref<8x1xf32, #tpu.memory_space<vmem>>, vector<8x1xf32>,
    return
  }
  func.func @transform_0(%arg0: i32) -> (i32, i32) {
    %c0_i32 = arith.constant 0 : i32
    %c0_i32_0 = arith.constant 0 : i32
    return %arg0, %c0_i32 : i32, i32
  }
  func.func @transform_1(%arg0: i32) -> (i32, i32) {
    %c0_i32 = arith.constant 0 : i32
    %c0_i32_0 = arith.constant 0 : i32
    return %arg0, %c0_i32 : i32, i32
  }
  func.func @transform_2(%arg0: i32) -> (i32, i32) {
    %c0_i32 = arith.constant 0 : i32
    %c0_i32_0 = arith.constant 0 : i32
    return %arg0, %c0_i32 : i32, i32
  }
}

</mosaic_0001>

<bundles_post_ra>
// kernel: tpu_custom_call.1
= control target key start
LH: loop header
LB: loop body
LE: loop exit
PB: predicated region body
PF: predicated region fallthrough
CT: control target
= control target key end

     0   :  { %vm13_vm0 = vcmask 261120   ;;  %v51_v1 = vmov 0   ;;  %v26_v6 = vlaneseq  ;;  %v52_v10 = vmov 0.003125   ;;  %s80_s0 = inlined_call_operand.vmem [shape: f32[8,32], index: 0, kind: input, shape index: {}]   ;;  %s81_s1 = inlined_call_operand.vmem [shape: s32[8,1], index: 1, kind: input, shape index: {}]   ;;  %s82_s2 = inlined_call_operand.vmem [shape: f32[8,1], index: 2, kind: output, shape index: {}]  }
   0x1   :  { %v11_v0 = vld [vmem:[%s80_s0] sm:$0xff]  ;;  %46 = vset.pattern.permute.xlu0 %v51_v1  ;;  %vm38_vm2 = vcmask 7168  }
   0x2   :  { %v14_v2 = vsel %vm13_vm0, %v11_v0, -inf  ;;  %v12_v3 = vld [vmem:[%s81_s1] sm:$0xff]  ;;  %v27_v8 = vand.u32 127, %v26_v6 }
   0x3   :  { %15 = vmax.xlane.f32.xlu0 %v14_v2 }
  0x19   :  { %29 = vperm.xlu0 %46, %v12_v3  }
  0x90   :  { %v16_v4 = vpop.xlane.xlu0 %15 }
  0x91   :  { %v17_v5 = vsub.f32 %v11_v0, %v16_v4 }
  0x93   :  { %v18_v7 = vmul.f32 1.442695, %v17_v5 }
  0x95   :  { %47 = vpow2.f32 %v18_v7 }
  0x98   :  { %v30_v9 = vpop.permute.xlu0 %29 }
  0x99   :  { %vm31_vm1 = vcmp.eq.s32.totalorder %v27_v8, %v30_v9 }
  0x9a   :  { %v32_v11 = vsel %vm31_vm1, 0.903125, %v52_v10 }
  0x9b   :  { %v33_v12 = vmul.f32 %v32_v11, %v11_v0 }
  0x9d   :  { %v34_v15 = vsel %vm13_vm0, %v33_v12, 0.0 }
  0x9f   :  { %v48_v13 = vpop.eup %47 }
  0xa0   :  { %v20_v14 = vsel %vm13_vm0, %v48_v13, 0.0 }
  0xa1   :  { %21 = vadd.xlane.f32.xlu1 %v20_v14 }
  0xa5   :  { %35 = vadd.xlane.f32.xlu1 %v34_v15 }
 0x12e   :  { %v22_v16 = vpop.xlane.xlu1 %21 }
 0x12f   :  { %49 = vlog2.f32 %v22_v16 }
 0x132   :  { %v36_v19 = vpop.xlane.xlu1 %35 }
 0x139   :  { %v50_v17 = vpop.eup %49 }
 0x13a   :  { %v24_v18 = vmul.f32 0.6931472, %v50_v17 }
 0x13c   :  { %v25_v20 = vadd.f32 %v24_v18, %v16_v4 }
 0x13e   :  { %v37_v21 = vsub.f32 %v25_v20, %v36_v19 }
 0x140   :  { %39 = vst.msk [vmem:[%s82_s2] sm:$0xff] %vm38_vm2, %v37_v21 }

</bundles_post_ra>
